<compile_context>
chip_gen: v7x
topology: tpu7x:2x2x1
jax: 0.10.0
libtpu: 0.0.40
codegen_flags: <defaults>
</compile_context>

<pallas_src>
import jax
import jax.numpy as jnp
from jax.experimental import pallas as pl
from jax.experimental.pallas import tpu as pltpu

n_embed = 40


def _round_up(x, m):
    return ((x + m - 1) // m) * m


def _ffn_kernel(x_ref, w1_ref, b1_ref, w2_ref, b2_ref, o_ref):
    # x_ref: (TILE_M, E); w1/w2: (E, E) pre-transposed so y = x @ w;
    # b1/b2: (1, E) kept in f32.  Both matmuls accumulate in f32 on the MXU.
    x = x_ref[...]
    h = jnp.dot(x, w1_ref[...], preferred_element_type=jnp.float32)
    h = jnp.maximum(h + b1_ref[...], 0.0)                       # bias + ReLU (f32)
    y = jnp.dot(h.astype(w2_ref.dtype), w2_ref[...],
                preferred_element_type=jnp.float32)
    o_ref[...] = (y + b2_ref[...]).astype(o_ref.dtype)


def feed_forward(x, w1, b1, w2, b2, *, tile_m=8192, stream_dtype=None):
    """x: (B, T, E). w1, w2: (E, E) stored so y = x @ w + b (transpose of
    PyTorch's nn.Linear weight). b1, b2: (E,).

    stream_dtype: dtype used for the HBM activation/weight stream and the
    output (e.g. jnp.bfloat16 for ~2x less HBM traffic).  None -> x.dtype.
    """
    B, T, E = x.shape
    assert E == n_embed
    M = B * T

    act_dtype = jnp.dtype(stream_dtype if stream_dtype is not None else x.dtype)

    # Tile the flattened row axis.  Cap so the grid has >= 4 steps (keeps both
    # v7x TensorCores busy via the parallel axis) and keep tiles sublane (x8)
    # aligned.  The last grid block may be partial -- no wrapper-side padding.
    tile_m = int(min(int(tile_m), _round_up(pl.cdiv(M, 4), 8)))
    tile_m = max(8, _round_up(tile_m, 8))
    grid_m = pl.cdiv(M, tile_m)

    x2d = x.reshape(M, E).astype(act_dtype)
    w1c = w1.astype(act_dtype)
    w2c = w2.astype(act_dtype)
    b1_2d = b1.reshape(1, E).astype(jnp.float32)
    b2_2d = b2.reshape(1, E).astype(jnp.float32)

    act_item = act_dtype.itemsize
    cost = pl.CostEstimate(
        flops=4 * M * E * E,                         # two (M,E)x(E,E) matmuls
        transcendentals=0,
        bytes_accessed=(2 * M * E + 2 * E * E) * act_item + 2 * E * 4,
    )

    # VMEM budget: 2 activation streams (in + out) x 2 buffers, with E=40
    # padded to the 128-lane vreg width inside VMEM; clamp to 56 MiB so we
    # never exceed v7x's 64 MiB per-TC VMEM (v5e/v6e have 128 MiB physical).
    lane_e = 128
    stream_bytes = 2 * 2 * tile_m * lane_e * act_item
    vmem_limit = int(min(56 * 1024 * 1024,
                         max(32 * 1024 * 1024, int(1.25 * stream_bytes))))

    out2d = pl.pallas_call(
        _ffn_kernel,
        out_shape=jax.ShapeDtypeStruct((M, E), act_dtype),
        grid=(grid_m,),
        in_specs=[
            pl.BlockSpec((tile_m, E), lambda i: (i, 0)),   # activation stream
            pl.BlockSpec((E, E), lambda i: (0, 0)),        # w1 (VMEM-resident)
            pl.BlockSpec((1, E), lambda i: (0, 0)),        # b1
            pl.BlockSpec((E, E), lambda i: (0, 0)),        # w2
            pl.BlockSpec((1, E), lambda i: (0, 0)),        # b2
        ],
        out_specs=pl.BlockSpec((tile_m, E), lambda i: (i, 0)),
        compiler_params=pltpu.CompilerParams(
            dimension_semantics=("parallel",),             # megacore on v7x
            vmem_limit_bytes=vmem_limit,
        ),
        cost_estimate=cost,
    )(x2d, w1c, b1_2d, w2c, b2_2d)

    return out2d.reshape(B, T, E)


def init_params(key, e):
    # Deterministic init mimicking nn.Linear's U(-1/sqrt(fan_in), 1/sqrt(fan_in)).
    k1, k2, k3, k4 = jax.random.split(key, 4)
    bound = 1.0 / jnp.sqrt(e)
    # Stored pre-transposed: (in, out) so the kernel does x @ w.
    w1 = jax.random.uniform(k1, (e, e), jnp.float32, -bound, bound)
    b1 = jax.random.uniform(k2, (e,), jnp.float32, -bound, bound)
    w2 = jax.random.uniform(k3, (e, e), jnp.float32, -bound, bound)
    b2 = jax.random.uniform(k4, (e,), jnp.float32, -bound, bound)
    return w1, b1, w2, b2


def _ref(x, w1, b1, w2, b2):
    return jnp.maximum(x @ w1 + b1, 0.0) @ w2 + b2


if __name__ == "__main__":
    key = jax.random.PRNGKey(0)
    kx, kp, kx2 = jax.random.split(key, 3)
    w1, b1, w2, b2 = init_params(kp, n_embed)

    # Small shape consistent with the module (evenly divided 2-step grid).
    B, T = 2, 8
    x = jax.random.normal(kx, (B, T, n_embed), dtype=jnp.float32)
    out = jax.block_until_ready(feed_forward(x, w1, b1, w2, b2))
    assert out.shape == (B, T, n_embed)
    assert jnp.allclose(out, _ref(x, w1, b1, w2, b2), atol=1e-5, rtol=1e-5)

    # Ragged shape (M = 2100): exercises the partial last block with no
    # wrapper-side padding pass.
    B2, T2 = 3, 700
    x2 = jax.random.normal(kx2, (B2, T2, n_embed), dtype=jnp.float32)
    out2 = jax.block_until_ready(feed_forward(x2, w1, b1, w2, b2))
    assert out2.shape == (B2, T2, n_embed)
    assert jnp.allclose(out2, _ref(x2, w1, b1, w2, b2), atol=1e-5, rtol=1e-5)

    # bf16 activation streaming (halved HBM traffic), f32 MXU accumulation.
    out3 = jax.block_until_ready(
        feed_forward(x2, w1, b1, w2, b2, stream_dtype=jnp.bfloat16))
    assert out3.shape == (B2, T2, n_embed)
    assert jnp.allclose(out3.astype(jnp.float32), _ref(x2, w1, b1, w2, b2),
                        atol=5e-2, rtol=5e-2)

    print("KERNEL_OK")
</pallas_src>

<mosaic_0001>
module attributes {stable_mosaic.version = 11 : i64} {
  func.func @_ffn_kernel(%arg0: i32, %arg1: memref<8x40xf32, #tpu.memory_space<vmem>>, %arg2: memref<40x40xf32, #tpu.memory_space<vmem>>, %arg3: memref<1x40xf32, #tpu.memory_space<vmem>>, %arg4: memref<40x40xf32, #tpu.memory_space<vmem>>, %arg5: memref<1x40xf32, #tpu.memory_space<vmem>>, %arg6: memref<8x40xf32, #tpu.memory_space<vmem>>) attributes {dimension_semantics = [#tpu.dimension_semantics<parallel>], iteration_bounds = array<i64: 2>, scalar_prefetch = 0 : i64, scratch_operands = 0 : i64, tpu.core_type = #tpu.core_type<tc>, window_params = [{transform_indices = @transform_0, window_bounds = array<i64: 8, 40>}, {pipeline_mode = #tpu.pipeline_mode<synchronous>, transform_indices = @transform_1, window_bounds = array<i64: 40, 40>}, {pipeline_mode = #tpu.pipeline_mode<synchronous>, transform_indices = @transform_2, window_bounds = array<i64: 1, 40>}, {pipeline_mode = #tpu.pipeline_mode<synchronous>, transform_indices = @transform_3, window_bounds = array<i64: 40, 40>}, {pipeline_mode = #tpu.pipeline_mode<synchronous>, transform_indices = @transform_4, window_bounds = array<i64: 1, 40>}, {transform_indices = @transform_5, window_bounds = array<i64: 8, 40>}]} {
    %c0 = arith.constant 0 : index
    %c0_0 = arith.constant 0 : index
    %0 = vector.load %arg1[%c0, %c0_0] : memref<8x40xf32, #tpu.memory_space<vmem>>, vector<8x40xf32>
    %c0_1 = arith.constant 0 : index
    %c0_2 = arith.constant 0 : index
    %1 = vector.load %arg2[%c0_1, %c0_2] : memref<40x40xf32, #tpu.memory_space<vmem>>, vector<40x40xf32>
    %cst = arith.constant dense<0.000000e+00> : vector<8x40xf32>
    %2 = tpu.matmul %0, %1, %cst {dimension_numbers = #tpu.dot_dimension_numbers<[1], [0], [0], [1], [0, 0, 1, 1], [], []>} : vector<8x40xf32>, vector<40x40xf32>, vector<8x40xf32> -> vector<8x40xf32>
    %c0_3 = arith.constant 0 : index
    %c0_4 = arith.constant 0 : index
    %3 = vector.load %arg3[%c0_3, %c0_4] : memref<1x40xf32, #tpu.memory_space<vmem>>, vector<1x40xf32>
    %4 = vector.broadcast %3 : vector<1x40xf32> to vector<8x40xf32>
    %5 = arith.addf %2, %4 : vector<8x40xf32>
    %cst_5 = arith.constant 0.000000e+00 : f32
    %6 = vector.broadcast %cst_5 : f32 to vector<8x40xf32>
    %7 = arith.maximumf %5, %6 : vector<8x40xf32>
    %c0_6 = arith.constant 0 : index
    %c0_7 = arith.constant 0 : index
    %8 = vector.load %arg4[%c0_6, %c0_7] : memref<40x40xf32, #tpu.memory_space<vmem>>, vector<40x40xf32>
    %cst_8 = arith.constant dense<0.000000e+00> : vector<8x40xf32>
    %9 = tpu.matmul %7, %8, %cst_8 {dimension_numbers = #tpu.dot_dimension_numbers<[1], [0], [0], [1], [0, 0, 1, 1], [], []>} : vector<8x40xf32>, vector<40x40xf32>, vector<8x40xf32> -> vector<8x40xf32>
    %c0_9 = arith.constant 0 : index
    %c0_10 = arith.constant 0 : index
    %10 = vector.load %arg5[%c0_9, %c0_10] : memref<1x40xf32, #tpu.memory_space<vmem>>, vector<1x40xf32>
    %11 = vector.broadcast %10 : vector<1x40xf32> to vector<8x40xf32>
    %12 = arith.addf %9, %11 : vector<8x40xf32>
    %c0_11 = arith.constant 0 : index
    %c0_12 = arith.constant 0 : index
    %13 = vector.load %arg6[%c0_11, %c0_12] : memref<8x40xf32, #tpu.memory_space<vmem>>, vector<8x40xf32>
    tpu.vector_store %arg6[%c0_11, %c0_12], %12 {strides = array<i32>} : memref<8x40xf32, #tpu.memory_space<vmem>>, vector<8x40xf32>,
    return
  }
  func.func @transform_0(%arg0: i32) -> (i32, i32) {
    %c0_i32 = arith.constant 0 : i32
    %c0_i32_0 = arith.constant 0 : i32
    return %arg0, %c0_i32 : i32, i32
  }
  func.func @transform_1(%arg0: i32) -> (i32, i32) {
    %c0_i32 = arith.constant 0 : i32
    %c0_i32_0 = arith.constant 0 : i32
    %c0_i32_1 = arith.constant 0 : i32
    return %c0_i32, %c0_i32_0 : i32, i32
  }
  func.func @transform_2(%arg0: i32) -> (i32, i32) {
    %c0_i32 = arith.constant 0 : i32
    %c0_i32_0 = arith.constant 0 : i32
    %c0_i32_1 = arith.constant 0 : i32
    return %c0_i32, %c0_i32_0 : i32, i32
  }
  func.func @transform_3(%arg0: i32) -> (i32, i32) {
    %c0_i32 = arith.constant 0 : i32
    %c0_i32_0 = arith.constant 0 : i32
    %c0_i32_1 = arith.constant 0 : i32
    return %c0_i32, %c0_i32_0 : i32, i32
  }
  func.func @transform_4(%arg0: i32) -> (i32, i32) {
    %c0_i32 = arith.constant 0 : i32
    %c0_i32_0 = arith.constant 0 : i32
    %c0_i32_1 = arith.constant 0 : i32
    return %c0_i32, %c0_i32_0 : i32, i32
  }
  func.func @transform_5(%arg0: i32) -> (i32, i32) {
    %c0_i32 = arith.constant 0 : i32
    %c0_i32_0 = arith.constant 0 : i32
    return %arg0, %c0_i32 : i32, i32
  }
}

</mosaic_0001>

<bundles_post_ra>
// kernel: tpu_custom_call.1
= control target key start
LH: loop header
LB: loop body
LE: loop exit
PB: predicated region body
PF: predicated region fallthrough
CT: control target
= control target key end

     0   :  { %10 = vsyncpa [#allocation3], 0  ;;  %s1127_s0 = inlined_call_operand.hbm [shape: f32[16,40], index: 0, kind: input, shape index: {}]   ;;  %s1128_s1 = inlined_call_operand.hbm [shape: f32[40,40], index: 1, kind: input, shape index: {}]   ;;  %s1129_s2 = inlined_call_operand.vmem [shape: f32[1,40], index: 2, kind: input, shape index: {}]   ;;  %s1130_s3 = inlined_call_operand.hbm [shape: f32[40,40], index: 3, kind: input, shape index: {}]   ;;  %s1131_s4 = inlined_call_operand.vmem [shape: f32[1,40], index: 4, kind: input, shape index: {}]   ;;  %s1132_s5 = inlined_call_operand.hbm [shape: f32[16,40], index: 5, kind: output, shape index: {}]  }
   0x1   :  { %12 = vsyncpa [#allocation3 + $0x1], 0 }
   0x2   :  { %13 = vsyncpa [#allocation6], 0 }
   0x3   :  { %14 = vsyncpa [#allocation4], 0 }
   0x4   :  { %16 = vsyncpa [#allocation4 + $0x1], 0  ;;  %s885_s18 = smov 0   ;;  %s887_s19 = smov 0  }
   0x5   :  { %s889_s20 = smov 0   ;;  %s891_s21 = smov 0  }
   0x6 LB: > { %s906_s22 = sadd.s32 4294967295, %s844_s21   ;;  %s546_s23 = sadd.s32 4294967294, %s844_s21   ;;  %s844_s21 = sphi %s891_s21, %s1152_s21   ;;  %s840_s20 = sphi %s889_s20, %s1151_s20   ;;  %s836_s19 = sphi %s887_s19, %s1150_s19   ;;  %s832_s18 = sphi %s885_s18, %s1149_s18  }
   0x7   : > { %p42_p0 = scmp.ne.s32.totalorder %s836_s19, %s832_s18  ;;  %p1133_p1 = scmp.eq.s32.totalorder %s906_s22, 0 }
   0x8   : > { %p156_p3 = scmp.eq.s32.totalorder %s546_s23, 1  ;;  %p547_p5 = scmp.ge.s32.totalorder %s844_s21, 1 }
   0x9   : > { %p915_p4 = por %p1133_p1, %p42_p0  ;;  %p163_p7 = scmp.lt.s32.totalorder %s844_s21, 3 }
   0xa   : > { %p920_p6 = por %p156_p3, %p42_p0  ;;  %s846_s27 = smov [#allocation5]  }
   0xb   : > { %s1136_s24 = scalar_select %p915_p4, 1, 0 }
   0xc   : > { %s1137_s25 = scalar_select %p920_p6, 1, 0 }
   0xd   : > { %p925_p8 = pnand %p547_p5, %p163_p7  ;;  %s175_s28 = sshll.u32 %s846_s27, 4  ;;  %s929_s28 = int_to_ptr.vmem [resolvable:$true] %s175_s28 }
   0xe   : > { %s847_s30 = smov [#allocation7]   ;;  %s688_s9 = scalar_lea.hbm %s1128_s1, 640 }
   0xf   : > { %p628_p9 = pneg %p925_p8  ;;  %s191_s6 = sshll.u32 %s847_s30, 4  ;;  %s940_s6 = int_to_ptr.vmem [resolvable:$true] %s191_s6 }
  0x10   : > { %p689_p12 = scmp.ne.s32.totalorder %s1128_s1, %s688_s9  ;;  %p695_p5 = scmp.lt.u32.totalorder %s688_s9, %s1128_s1 }
  0x11   : > { %p936_p11 = pnand %p628_p9, %p1133_p1 }
  0x13   : > { %p690_p13 = pneg %p936_p11 }
  0x15   : > { %p691_p0 = pnand %p690_p13, %p689_p12 }
  0x17   : > { %p692_p3 = pneg %p691_p0 }
  0x19   : > { %p697_p7 = pnand %p695_p5, %p692_p3 }
  0x1b   : > { %700 = shalt.err (!%p697_p7)
}
  0x1c   : > { %s701_s14 = scalar_lea.vmem %s929_s28, 640  ;;  %p709_p2 = scmp.lt.s32.totalorder %s929_s28, %s929_s28 }
  0x1d   : > { %p702_p9 = scmp.ne.s32.totalorder %s929_s28, %s701_s14  ;;  %p710_p12 = scmp.lt.s32.totalorder %s701_s14, %s701_s14 }
  0x1f   : > { %p704_p10 = pnand %p702_p9, %p690_p13  ;;  %p711_p0 = por %p710_p12, %p709_p2 }
  0x21   : > { %p705_p1 = pneg %p704_p10 }
  0x23   : > { %p712_p6 = pnand %p711_p0, %p705_p1 }
  0x25   : > { %715 = shalt.err (!%p712_p6)
}
  0x26   : > { %s848_s15 = smov 128   ;;  %s849_s16 = smov 8  }
  0x27   : > { %631 = dma.hbm_to_vmem [thread:$0]  (!%p936_p11), %s1128_s1, 640, %s929_s28, [#allocation6], %s848_s15, %s848_s15, %s849_s16  }
  0x28   : > { %s716_s7 = scalar_lea.hbm %s1130_s3, 640 }
  0x29   : > { %p717_p2 = scmp.ne.s32.totalorder %s1130_s3, %s716_s7  ;;  %p723_p10 = scmp.lt.u32.totalorder %s716_s7, %s1130_s3 }
  0x2b   : > { %p719_p1 = pnand %p717_p2, %p690_p13 }
  0x2d   : > { %p720_p6 = pneg %p719_p1 }
  0x2f   : > { %p725_p3 = pnand %p723_p10, %p720_p6 }
  0x31   : > { %728 = shalt.err (!%p725_p3)
}
  0x32   : > { %s729_s28 = scalar_lea.vmem %s940_s6, 640  ;;  %p737_p12 = scmp.lt.s32.totalorder %s940_s6, %s940_s6 }
  0x33   : > { %p730_p5 = scmp.ne.s32.totalorder %s940_s6, %s729_s28  ;;  %p738_p0 = scmp.lt.s32.totalorder %s729_s28, %s729_s28 }
  0x35   : > { %p732_p7 = pnand %p730_p5, %p690_p13  ;;  %p739_p2 = por %p738_p0, %p737_p12 }
  0x37   : > { %p733_p9 = pneg %p732_p7 }
  0x39   : > { %p740_p1 = pnand %p739_p2, %p733_p9 }
  0x3b   : > { %743 = shalt.err (!%p740_p1)
}
  0x3c   : > { %634 = dma.hbm_to_vmem [thread:$0]  (!%p936_p11), %s1130_s3, 640, %s940_s6, [#allocation6], %s848_s15, %s848_s15, %s849_s16  }
  0x3d   : > { %s995_s14 = sadd.s32 1, %s844_s21   ;;  %s29_s29 = sadd.s32 1, %s840_s20 }
  0x3e   : > { %s26_s17 = ssub.s32 %s844_s21, %s995_s14  ;;  %p36_p13 = scmp.ne.s32.totalorder %s840_s20, %s836_s19 }
  0x3f   : > { %p27_p6 = scmp.eq.s32.totalorder %s26_s17, 0  ;;  %p37_p10 = scmp.eq.s32.totalorder %s844_s21, 0 }
  0x40   : > { %p1140_p3 = scmp.eq.s32.totalorder %s906_s22, 1  ;;  %p645_p7 = scmp.lt.s32.totalorder %s844_s21, 2 }
  0x41   : > { %s1011_s27 = scalar_select %p27_p6, %s840_s20, %s29_s29  }
  0x42   : > { %p1005_p5 = por %p1140_p3, %p36_p13  ;;  %p38_p9 = por %p37_p10, %p36_p13 }
  0x43   : > { %s208_s30 = sand.u32 1, %s840_s20   ;;  %s552_s6 = sshll.u32 %s844_s21, 7 }
  0x44   : > { %s1141_s23 = scalar_select %p1005_p5, 1, 0 }
  0x45   : > { %s551_s7 = sshll.u32 %s208_s30, 3  ;;  %s1018_s8 = scalar_lea.hbm %s1127_s0, %s552_s6 }
  0x46   : > { %s212_s9 = scalar_lea.vmem [#allocation2], %s551_s7  ;;  %p1022_p11 = pnand %p645_p7, %p38_p9 }
  0x47   : > { %s219_s10 = sshll.u32 %s212_s9, 4  ;;  %s209_s28 = scalar_lea.sflag [#allocation3], %s208_s30  ;;  %s1020_s10 = int_to_ptr.vmem [resolvable:$true] %s219_s10 }
  0x48   : > { %s744_s12 = scalar_lea.hbm %s1018_s8, 128  ;;  %p746_p0 = pneg %p1022_p11 }
  0x49   : > { %p745_p12 = scmp.ne.s32.totalorder %s1018_s8, %s744_s12  ;;  %s749_s17 = scalar_lea.hbm %s1127_s0, 256 }
  0x4a   : > { %p750_p13 = scmp.lt.u32.totalorder %s1018_s8, %s1127_s0  ;;  %p751_p6 = scmp.lt.u32.totalorder %s749_s17, %s744_s12 }
  0x4b   : > { %p747_p2 = pnand %p746_p0, %p745_p12  ;;  %p753_p3 = scmp.lt.u32.totalorder %s744_s12, %s1018_s8 }
  0x4c   : > { %p752_p10 = por %p751_p6, %p750_p13 }
  0x4d   : > { %p748_p1 = pneg %p747_p2 }
  0x4e   : > { %p754_p7 = por %p753_p3, %p752_p10 }
  0x50   : > { %p755_p9 = pnand %p754_p7, %p748_p1 }
  0x52   : > { %758 = shalt.err (!%p755_p9)
}
  0x53   : > { %s759_s30 = scalar_lea.vmem %s1020_s10, 128  ;;  %s850_s15 = smov [#allocation2]  }
  0x54   : > { %p760_p12 = scmp.ne.s32.totalorder %s1020_s10, %s759_s30  ;;  %s764_s16 = sshll.u32 %s850_s15, 4  ;;  %s765_s16 = int_to_ptr.vmem [resolvable:$false] %s764_s16 }
  0x55   : > { %s766_s9 = scalar_lea.vmem %s765_s16, 256  ;;  %p767_p4 = scmp.lt.s32.totalorder %s1020_s10, %s765_s16 }
  0x56   : > { %p762_p2 = pnand %p760_p12, %p746_p0  ;;  %p768_p13 = scmp.lt.s32.totalorder %s766_s9, %s759_s30 }
  0x58   : > { %p763_p5 = pneg %p762_p2  ;;  %p769_p6 = por %p768_p13, %p767_p4 }
  0x5a   : > { %p770_p10 = pnand %p769_p6, %p763_p5 }
  0x5c   : > { %773 = shalt.err (!%p770_p10)
}
  0x5d   : > { %638 = dma.hbm_to_vmem [thread:$0]  (!%p1022_p11), %s1018_s8, 128, %s1020_s10, %s209_s28  }
  0x5e   : > { %228 = sbr.rel (%p925_p8) target bundleno = 561 (0x231), region = 40  ;;  %s1054_s12 = sand.u32 (!%p925_p8), 1, %s836_s19  }
  0x5f   : > { %s554_s13 = sshll.u32 (!%p925_p8), %s1054_s12, 3  ;;  %s231_s29 = scalar_lea.sflag (!%p925_p8), [#allocation3], %s1054_s12 }
  0x60   : > { %s234_s17 = scalar_lea.vmem (!%p925_p8), [#allocation2], %s554_s13  ;;  %p1143_p4 = scmp.ne.s32.totalorder (!%p925_p8), %s1136_s24, 0 }
  0x65   : > { %819 = dma.done.wait (%p1143_p4), %s231_s29, 128  }
  0x66   : > { %821 = vsyncadd (%p1143_p4), %s231_s29, 4294967168  ;;  %p1144_p5 = scmp.eq.s32.totalorder %s906_s22, 0 }
  0x68   : > { %823 = dma.done.wait (%p1144_p5), [#allocation6], 1280   ;;  %p1145_p8 = pmov %p1144_p5 }
  0x69   : > { %v851_v0 = vmov 0.0|0.0   ;;  %vm852_vm0 = vmmov 0   ;;  %v853_v1 = vmov 0.0   ;;  %v270_v2 = vld [vmem:[#allocation5] sm:$0xff]  ;;  %v271_v3 = vld [vmem:[#allocation5 + $0x8] sm:$0xff]  ;;  %v272_v4 = vld [vmem:[#allocation5 + $0x10] sm:$0xff] }
  0x6a   : > { %825 = vsyncadd (%p1145_p8), [#allocation6], 4294966016  ;;  %604 = vmatprep.subr.bf16.mxu0 %v851_v0  ;;  %588 = vmatprep.mubr.msk.f32.mxu0 %vm852_vm0, %v853_v1  ;;  %v605_v5 = vpack.c.bf16 %v271_v3, %v270_v2  ;;  %v273_v6 = vld [vmem:[#allocation5 + $0x18] sm:$0xff]  ;;  %v357_v7 = vld [vmem:[#allocation7] sm:$0xff]  ;;  %vm282_vm1 = vcmask 326656   ;;  %s563_s11 = sshll.u32 %s906_s22, 7 }
  0x6b   : > { %610 = vmatprep.subr.bf16.mxu1 %v851_v0  ;;  %601 = vmatprep.mubr.msk.f32.mxu1 %vm852_vm0, %v853_v1  ;;  %v358_v8 = vld [vmem:[#allocation7 + $0x8] sm:$0xff]  ;;  %v608_v9 = vpack.c.bf16 %v273_v6, %v272_v4  ;;  %v274_v11 = vld [vmem:[#allocation5 + $0x20] sm:$0xff]  ;;  %v359_v13 = vld [vmem:[#allocation7 + $0x10] sm:$0xff]  ;;  %s268_s28 = scalar_lea.vmem [#allocation8], %s554_s13  ;;  %s1082_s15 = scalar_lea.hbm %s1132_s5, %s563_s11 }
  0x6c   : > { %606 = vmatpush3.bf16.msra.mxu0 %v605_v5  ;;  %v611_v10 = vpack.c.bf16 %v358_v8, %v357_v7  ;;  %v269_v12 = vld [vmem:[%s234_s17] sm:$0xff]  ;;  %v360_v14 = vld [vmem:[#allocation7 + $0x18] sm:$0xff]  ;;  %v361_v16 = vld [vmem:[#allocation7 + $0x20] sm:$0xff]  ;;  %s457_s7 = sshll.u32 %s268_s28, 4  ;;  %s444_s16 = scalar_lea.sflag [#allocation4], %s1054_s12  ;;  %s1084_s7 = int_to_ptr.vmem [resolvable:$true] %s457_s7 }
  0x6d   : > { %607 = vmatprep.subr.bf16.mxu0 %v851_v0  ;;  %v614_v15 = vpack.c.bf16 %v360_v14, %v359_v13  ;;  %v558_v17 = vld [vmem:[%s1129_s2] ss:$0 sm:$0xff]  ;;  %s774_s22 = scalar_lea.vmem %s1084_s7, 128  ;;  %p1146_p0 = scmp.ne.s32.totalorder %s1141_s23, 0 }
  0x6e   : > { %612 = vmatpush3.bf16.msra.mxu1 %v611_v10  ;;  %v560_v22 = vld [vmem:[%s1131_s4] ss:$0 sm:$0xff]  ;;  %p775_p11 = scmp.ne.s32.totalorder %s1084_s7, %s774_s22  ;;  %s854_s9 = smov [#allocation8]  }
  0x6f   : > { %613 = vmatprep.subr.bf16.mxu1 %v851_v0  ;;  %s778_s13 = sshll.u32 %s854_s9, 4  ;;  %s779_s13 = int_to_ptr.vmem [resolvable:$false] %s778_s13 }
  0x70   : > { %609 = vmatpush3.bf16.msra.mxu0 %v608_v9  ;;  %p776_p1 = pnand %p775_p11, %p1146_p0  ;;  %s780_s29 = scalar_lea.vmem %s779_s13, 256 }
  0x71   : > { %586 = vmatprep.subr.mxu0 %v853_v1  ;;  %p781_p7 = scmp.lt.s32.totalorder %s1084_s7, %s779_s13  ;;  %p782_p9 = scmp.lt.s32.totalorder %s780_s29, %s774_s22 }
  0x72   : > { %615 = vmatpush3.bf16.msra.mxu1 %v614_v15  ;;  %p777_p3 = pneg %p776_p1 }
  0x73   : > { %599 = vmatprep.subr.mxu1 %v853_v1  ;;  %p783_p12 = por %p782_p9, %p781_p7 }
  0x74   : > { %587 = vmatpush3.msra.mxu0 %v274_v11 }
  0x75   : > { %589 = vmatmul.mubr.msk.f32.vlgmr.msra.gmra.mrb[0].mxu0 %vm282_vm1, %v269_v12  ;;  %p784_p2 = pnand %p783_p12, %p777_p3 }
  0x76   : > { %600 = vmatpush3.msra.mxu1 %v361_v16 }
 0x148   : > { %v352_v18 = vpop.f32.mrb[0].mxu0 }
 0x149   : > { %v353_v19 = vadd.f32 %v558_v17, %v352_v18  ;;  %v590_v20 = vpop.f32.mrb[1].mxu0 }
 0x14b   : > { %v356_v21 = vmax.f32 %v353_v19, 0.0 }
 0x14d   : > { %602 = vmatmul.mubr.msk.f32.vlgmr.msra.gmra.mrb[0].mxu1 %vm282_vm1, %v356_v21 }
 0x220   : > { %v438_v23 = vpop.f32.mrb[0].mxu1 }
 0x221   : > { %v439_v24 = vadd.f32 %v560_v22, %v438_v23  ;;  %v603_v25 = vpop.f32.mrb[1].mxu1 }
 0x223   : > { %442 = vst.msk [vmem:[%s268_s28] sm:$0xff] %vm282_vm1, %v439_v24 }
 0x224   : > { %787 = shalt.err (!%p784_p2)
}
 0x225   : > { %s788_s12 = scalar_lea.hbm %s1082_s15, 128  ;;  %s792_s26 = scalar_lea.hbm %s1132_s5, 256 }
 0x226   : > { %p789_p13 = scmp.ne.s32.totalorder %s1082_s15, %s788_s12  ;;  %p793_p4 = scmp.lt.u32.totalorder %s1082_s15, %s1132_s5 }
 0x227   : > { %p794_p5 = scmp.lt.u32.totalorder %s792_s26, %s788_s12  ;;  %p796_p11 = scmp.lt.u32.totalorder %s788_s12, %s1082_s15 }
 0x228   : > { %p790_p6 = pnand %p789_p13, %p1146_p0 }
 0x229   : > { %p795_p8 = por %p794_p5, %p793_p4 }
 0x22a   : > { %p791_p10 = pneg %p790_p6 }
 0x22b   : > { %p797_p1 = por %p796_p11, %p795_p8 }
 0x22d   : > { %p798_p3 = pnand %p797_p1, %p791_p10 }
 0x22f   : > { %801 = shalt.err (!%p798_p3)
}
 0x230   : > { %626 = dma.vmem_to_hbm [thread:$0]  (%p1146_p0), %s1084_s7, 128, %s1082_s15, %s444_s16  }
 0x231 PF: > { %s469_s11 = sand.u32 1, %s832_s18   ;;  %p1147_p7 = scmp.ne.s32.totalorder %s1137_s25, 0 }
 0x232   : > { %p1148_p9 = scmp.ge.s32.totalorder %s844_s21, 2  ;;  %s470_s28 = scalar_lea.sflag [#allocation4], %s469_s11 }
 0x234   : > { %p640_p12 = pnand %p1148_p9, %p1147_p7 }
 0x236   : > { %827 = dma.done.wait (!%p640_p12), %s470_s28, 128  }
 0x237   : > { %829 = vsyncadd (!%p640_p12), %s470_s28, 4294967168  ;;  %p19_p2 = scmp.ge.s32.totalorder %s995_s14, 4   ;;  %s1149_s18 = smov %s836_s19 }
 0x238   : > { %s1150_s19 = smov %s840_s20  ;;  %s1151_s20 = smov %s1011_s27 }
 0x239   : > { %s1152_s21 = smov %s995_s14  ;;  %21 = sbr.rel (!%p19_p2) target bundleno = 6 (0x6), region = 93 }
 0x240   :  { %475 = vsyncpa [#allocation3], 1 }
 0x241   :  { %477 = vsyncpa [#allocation3 + $0x1], 1 }
 0x242   :  { %478 = vsyncpa [#allocation6], 1 }
 0x243   :  { %479 = vsyncpa [#allocation4], 1 }
 0x244   :  { %481 = vsyncpa [#allocation4 + $0x1], 1 }

</bundles_post_ra>
